<compile_context>
chip_gen: v7x
topology: tpu7x:2x2x1
jax: 0.10.0
libtpu: 0.0.40
codegen_flags: <defaults>
</compile_context>

<pallas_src>
import functools

import jax
import jax.numpy as jnp
from jax.experimental import pallas as pl
from jax.experimental.pallas import tpu as pltpu


# ----------------------------- Pallas kernel -------------------------------

def _fused_kernel(xf_ref, raft_w_ref,
                  rgb_w_ref, rgb_b_ref, flow_w_ref, flow_b_ref,
                  a_ref, vw_ref, vb_ref,
                  img_ref, flow_ref, aud_ref, *, inv_n):
    """Single invocation.  xf_ref: (C, T, P) lane-dense frame stack (P = s*s)."""
    C, T, _ = xf_ref.shape
    x = xf_ref[...]                                   # whole stack, loaded once

    # ---- RGB branch: pooled means of frames 0..T-2 -> 1024-d projection ----
    # ScaleTo1_1 is affine, folded into the final scale (raw sums only).
    img = rgb_b_ref[...]                              # (1, feat)
    for c in range(C):
        m = jnp.sum(x[c, :T - 1, :]) * (inv_n * 2.0 / 255.0) - 1.0
        img = img + m * rgb_w_ref[c:c + 1, :]
    img_ref[...] = img

    # ---- Flow branch: per-pixel RAFT stand-in (scalar-weighted VPU mix) ----
    d0 = x[0, 1:T, :] - x[0, :T - 1, :]               # (T-1, P)
    d1 = x[1, 1:T, :] - x[1, :T - 1, :]
    d2 = x[2, 1:T, :] - x[2, :T - 1, :]
    fu = raft_w_ref[0, 0] * d0 + raft_w_ref[1, 0] * d1 + raft_w_ref[2, 0] * d2
    fv = raft_w_ref[0, 1] * d0 + raft_w_ref[1, 1] * d1 + raft_w_ref[2, 1] * d2

    def flow_tx(f):
        # Clamp(-20, 20) -> ToUInt8 stand-in (map [-20,20] to [0,255], truncate)
        # -> ScaleTo1_1.  (Not exact torch uint8-cast semantics; stand-in.)
        f = jnp.clip(f, -20.0, 20.0)
        f = jnp.floor((f + 20.0) * (255.0 / 40.0))
        return f * (2.0 / 255.0) - 1.0

    mu = jnp.sum(flow_tx(fu)) * inv_n
    mv = jnp.sum(flow_tx(fv)) * inv_n
    flow_ref[...] = (flow_b_ref[...]
                     + mu * flow_w_ref[0:1, :] + mv * flow_w_ref[1:2, :])

    # ---- Audio branch: VGGish stand-in (linear + ReLU, lane-dense 128 out) ----
    h = jnp.dot(a_ref[...], vw_ref[...],
                preferred_element_type=jnp.float32) + vb_ref[...]
    aud_ref[...] = jnp.maximum(h, 0.0)


# ----------------------------- pallas_call glue ----------------------------

def fused_forward(x, raft_w, rgb_w, rgb_b, flow_w, flow_b,
                  audio, vgg_w, vgg_b, crop_size):
    """x: (T, C, H, W) float frames in [0, 255]; audio: (frames, D_in)."""
    T, C, H, W = x.shape
    s = min(crop_size, H, W)
    h0, w0 = (H - s) // 2, (W - s) // 2
    # TensorCenterCrop + lane-dense relayout: (C, T, s*s); last dim 256 = 2*128.
    # TODO(synk): at realistic resolutions fold the crop into the DMA window
    # (Element-offset BlockSpecs / manual copy) instead of this wrapper copy.
    xf = x[:, :, h0:h0 + s, w0:w0 + s].reshape(T, C, s * s).transpose(1, 0, 2)

    inv_n = 1.0 / float((T - 1) * s * s)
    feat = rgb_w.shape[1]
    frames, _ = audio.shape
    d_out = vgg_w.shape[1]
    kernel = functools.partial(_fused_kernel, inv_n=inv_n)

    vmem = pl.BlockSpec(memory_space=pltpu.MemorySpace.VMEM)
    smem = pl.BlockSpec(memory_space=pltpu.MemorySpace.SMEM)

    img_f, flow_f, aud_f = pl.pallas_call(
        kernel,
        # Single invocation (no grid): every operand is resident in VMEM/SMEM,
        # each DMA'd exactly once; no per-step pipeline overhead.
        in_specs=[
            vmem,   # xf          (C, T, s*s)
            smem,   # raft_w      (3, 2)  tiny scalar mixing weights
            vmem,   # rgb_w       (3, feat)
            vmem,   # rgb_b       (1, feat)
            vmem,   # flow_w      (2, feat)
            vmem,   # flow_b      (1, feat)
            vmem,   # audio       (frames, d_in)
            vmem,   # vgg_w       (d_in, d_out)
            vmem,   # vgg_b       (1, d_out)
        ],
        out_specs=[vmem, vmem, vmem],
        out_shape=[
            jax.ShapeDtypeStruct((1, feat), jnp.float32),
            jax.ShapeDtypeStruct((1, feat), jnp.float32),
            jax.ShapeDtypeStruct((frames, d_out), jnp.float32),
        ],
    )(xf, raft_w, rgb_w, rgb_b, flow_w, flow_b, audio, vgg_w, vgg_b)
    return img_f, flow_f, aud_f


# ------------------------------- model -------------------------------------

class ImgAudioFeatureExtractionPallas:
    """Pallas port of Img_Audio_Feature_Extraction.forward (synthetic weights)."""

    def __init__(self, key, central_crop_size=16, feat_dim=1024,
                 audio_feat_dim=128, audio_in_dim=32):
        k1, k2, k3, k4 = jax.random.split(key, 4)
        self.central_crop_size = central_crop_size
        # RAFT stand-in flow head: channels(3) -> flow(2)
        self.raft_w = 0.1 * jax.random.normal(k1, (3, 2), jnp.float32)
        # I3D rgb / flow stand-in projections -> feat_dim features
        self.i3d_rgb_w = 0.02 * jax.random.normal(k2, (3, feat_dim), jnp.float32)
        self.i3d_rgb_b = jnp.zeros((1, feat_dim), jnp.float32)
        self.i3d_flow_w = 0.02 * jax.random.normal(k3, (2, feat_dim), jnp.float32)
        self.i3d_flow_b = jnp.zeros((1, feat_dim), jnp.float32)
        # VGGish stand-in -> audio_feat_dim audio embedding
        self.vggish_w = 0.05 * jax.random.normal(
            k4, (audio_in_dim, audio_feat_dim), jnp.float32)
        self.vggish_b = jnp.zeros((1, audio_feat_dim), jnp.float32)

    def __call__(self, x, audio_input):
        # x: (T, C, H, W) uint8-range float frames; audio_input: (frames, D)
        return fused_forward(
            x, self.raft_w, self.i3d_rgb_w, self.i3d_rgb_b,
            self.i3d_flow_w, self.i3d_flow_b,
            audio_input, self.vggish_w, self.vggish_b,
            self.central_crop_size)


# ------------------------------ reference ----------------------------------

def _reference(model, x, audio):
    s = min(model.central_crop_size, x.shape[2], x.shape[3])
    h0, w0 = (x.shape[2] - s) // 2, (x.shape[3] - s) // 2
    xc = x[:, :, h0:h0 + s, w0:w0 + s]
    x0, x1 = xc[:-1], xc[1:]

    rgb_mean = (x0 / 255.0 * 2.0 - 1.0).mean(axis=(0, 2, 3))          # (3,)
    img_f = (rgb_mean[0] * model.i3d_rgb_w[0] + rgb_mean[1] * model.i3d_rgb_w[1]
             + rgb_mean[2] * model.i3d_rgb_w[2])[None, :] + model.i3d_rgb_b

    d = x1 - x0                                                        # (T-1,3,s,s)
    fu = (d * model.raft_w[:, 0][None, :, None, None]).sum(axis=1)
    fv = (d * model.raft_w[:, 1][None, :, None, None]).sum(axis=1)

    def tx(f):
        f = jnp.clip(f, -20.0, 20.0)
        f = jnp.floor((f + 20.0) * (255.0 / 40.0))
        return f * (2.0 / 255.0) - 1.0

    fm = jnp.stack([tx(fu).mean(), tx(fv).mean()])
    flow_f = (fm[0] * model.i3d_flow_w[0]
              + fm[1] * model.i3d_flow_w[1])[None, :] + model.i3d_flow_b

    aud = jnp.maximum(jnp.dot(audio, model.vggish_w) + model.vggish_b, 0.0)
    return img_f, flow_f, aud


if __name__ == "__main__":
    key = jax.random.PRNGKey(0)
    kx, ka, kp = jax.random.split(key, 3)
    # Small shapes: 5 frames, 3 channels, 16x16 spatial; 4 audio frames of 32 dims.
    x = jax.random.uniform(kx, (5, 3, 16, 16), jnp.float32, 0.0, 255.0)
    audio = jax.random.normal(ka, (4, 32), jnp.float32)

    model = ImgAudioFeatureExtractionPallas(kp, central_crop_size=16)
    img_f, flow_f, aud_f = model(x, audio)
    jax.block_until_ready((img_f, flow_f, aud_f))

    assert img_f.shape == (1, 1024)
    assert flow_f.shape == (1, 1024)
    assert aud_f.shape == (4, 128)

    ri, rf, ra = _reference(model, x, audio)
    assert jnp.allclose(img_f, ri, rtol=1e-2, atol=1e-2)
    assert jnp.allclose(flow_f, rf, rtol=1e-2, atol=1e-2)
    assert jnp.allclose(aud_f, ra, rtol=1e-2, atol=1e-2)

    print("KERNEL_OK")
</pallas_src>

<mosaic_0001>
module attributes {stable_mosaic.version = 11 : i64} {
  func.func @_fused_kernel(%arg0: memref<3x5x256xf32, #tpu.memory_space<vmem>>, %arg1: memref<3x2xf32, #tpu.memory_space<smem>>, %arg2: memref<3x1024xf32, #tpu.memory_space<vmem>>, %arg3: memref<1x1024xf32, #tpu.memory_space<vmem>>, %arg4: memref<2x1024xf32, #tpu.memory_space<vmem>>, %arg5: memref<1x1024xf32, #tpu.memory_space<vmem>>, %arg6: memref<4x32xf32, #tpu.memory_space<vmem>>, %arg7: memref<32x128xf32, #tpu.memory_space<vmem>>, %arg8: memref<1x128xf32, #tpu.memory_space<vmem>>, %arg9: memref<1x1024xf32, #tpu.memory_space<vmem>>, %arg10: memref<1x1024xf32, #tpu.memory_space<vmem>>, %arg11: memref<4x128xf32, #tpu.memory_space<vmem>>) attributes {dimension_semantics = [], scalar_prefetch = 0 : i64, scratch_operands = 0 : i64, tpu.core_type = #tpu.core_type<tc>} {
    %c0 = arith.constant 0 : index
    %c0_0 = arith.constant 0 : index
    %c0_1 = arith.constant 0 : index
    %0 = vector.load %arg0[%c0, %c0_0, %c0_1] : memref<3x5x256xf32, #tpu.memory_space<vmem>>, vector<3x5x256xf32>
    %c0_2 = arith.constant 0 : index
    %c0_3 = arith.constant 0 : index
    %1 = vector.load %arg3[%c0_2, %c0_3] : memref<1x1024xf32, #tpu.memory_space<vmem>>, vector<1x1024xf32>
    %2 = vector.extract_strided_slice %0 {offsets = [0, 0, 0], sizes = [1, 4, 256], strides = [1, 1, 1]} : vector<3x5x256xf32> to vector<1x4x256xf32>
    %3 = vector.shape_cast %2 : vector<1x4x256xf32> to vector<4x256xf32>
    %4 = vector.shape_cast %3 : vector<4x256xf32> to vector<1x4x256xf32>
    %cst = arith.constant dense<0.000000e+00> : vector<1xf32>
    %5 = vector.multi_reduction <add>, %4, %cst [1, 2] : vector<1x4x256xf32> to vector<1xf32>
    %6 = vector.shape_cast %5 : vector<1xf32> to vector<1x1x1xf32>
    %7 = vector.extract %6[0, 0, 0] : f32 from vector<1x1x1xf32>
    %cst_4 = arith.constant 7.65931418E-6 : f32
    %8 = arith.mulf %7, %cst_4 : f32
    %cst_5 = arith.constant 1.000000e+00 : f32
    %9 = arith.subf %8, %cst_5 : f32
    %c0_6 = arith.constant 0 : index
    %c0_7 = arith.constant 0 : index
    %10 = vector.load %arg2[%c0_6, %c0_7] : memref<3x1024xf32, #tpu.memory_space<vmem>>, vector<1x1024xf32>
    %11 = vector.broadcast %9 : f32 to vector<1x1024xf32>
    %12 = arith.mulf %11, %10 : vector<1x1024xf32>
    %13 = arith.addf %1, %12 : vector<1x1024xf32>
    %14 = vector.extract_strided_slice %0 {offsets = [1, 0, 0], sizes = [1, 4, 256], strides = [1, 1, 1]} : vector<3x5x256xf32> to vector<1x4x256xf32>
    %15 = vector.shape_cast %14 : vector<1x4x256xf32> to vector<4x256xf32>
    %16 = vector.shape_cast %15 : vector<4x256xf32> to vector<1x4x256xf32>
    %cst_8 = arith.constant dense<0.000000e+00> : vector<1xf32>
    %17 = vector.multi_reduction <add>, %16, %cst_8 [1, 2] : vector<1x4x256xf32> to vector<1xf32>
    %18 = vector.shape_cast %17 : vector<1xf32> to vector<1x1x1xf32>
    %19 = vector.extract %18[0, 0, 0] : f32 from vector<1x1x1xf32>
    %cst_9 = arith.constant 7.65931418E-6 : f32
    %20 = arith.mulf %19, %cst_9 : f32
    %cst_10 = arith.constant 1.000000e+00 : f32
    %21 = arith.subf %20, %cst_10 : f32
    %c1 = arith.constant 1 : index
    %c0_11 = arith.constant 0 : index
    %22 = vector.load %arg2[%c1, %c0_11] : memref<3x1024xf32, #tpu.memory_space<vmem>>, vector<1x1024xf32>
    %23 = vector.broadcast %21 : f32 to vector<1x1024xf32>
    %24 = arith.mulf %23, %22 : vector<1x1024xf32>
    %25 = arith.addf %13, %24 : vector<1x1024xf32>
    %26 = vector.extract_strided_slice %0 {offsets = [2, 0, 0], sizes = [1, 4, 256], strides = [1, 1, 1]} : vector<3x5x256xf32> to vector<1x4x256xf32>
    %27 = vector.shape_cast %26 : vector<1x4x256xf32> to vector<4x256xf32>
    %28 = vector.shape_cast %27 : vector<4x256xf32> to vector<1x4x256xf32>
    %cst_12 = arith.constant dense<0.000000e+00> : vector<1xf32>
    %29 = vector.multi_reduction <add>, %28, %cst_12 [1, 2] : vector<1x4x256xf32> to vector<1xf32>
    %30 = vector.shape_cast %29 : vector<1xf32> to vector<1x1x1xf32>
    %31 = vector.extract %30[0, 0, 0] : f32 from vector<1x1x1xf32>
    %cst_13 = arith.constant 7.65931418E-6 : f32
    %32 = arith.mulf %31, %cst_13 : f32
    %cst_14 = arith.constant 1.000000e+00 : f32
    %33 = arith.subf %32, %cst_14 : f32
    %c2 = arith.constant 2 : index
    %c0_15 = arith.constant 0 : index
    %34 = vector.load %arg2[%c2, %c0_15] : memref<3x1024xf32, #tpu.memory_space<vmem>>, vector<1x1024xf32>
    %35 = vector.broadcast %33 : f32 to vector<1x1024xf32>
    %36 = arith.mulf %35, %34 : vector<1x1024xf32>
    %37 = arith.addf %25, %36 : vector<1x1024xf32>
    %c0_16 = arith.constant 0 : index
    %c0_17 = arith.constant 0 : index
    %38 = vector.load %arg9[%c0_16, %c0_17] : memref<1x1024xf32, #tpu.memory_space<vmem>>, vector<1x1024xf32>
    tpu.vector_store %arg9[%c0_16, %c0_17], %37 {strides = array<i32>} : memref<1x1024xf32, #tpu.memory_space<vmem>>, vector<1x1024xf32>,
    %39 = vector.extract_strided_slice %0 {offsets = [0, 1, 0], sizes = [1, 4, 256], strides = [1, 1, 1]} : vector<3x5x256xf32> to vector<1x4x256xf32>
    %40 = vector.shape_cast %39 : vector<1x4x256xf32> to vector<4x256xf32>
    %41 = vector.extract_strided_slice %0 {offsets = [0, 0, 0], sizes = [1, 4, 256], strides = [1, 1, 1]} : vector<3x5x256xf32> to vector<1x4x256xf32>
    %42 = vector.shape_cast %41 : vector<1x4x256xf32> to vector<4x256xf32>
    %43 = arith.subf %40, %42 : vector<4x256xf32>
    %44 = vector.extract_strided_slice %0 {offsets = [1, 1, 0], sizes = [1, 4, 256], strides = [1, 1, 1]} : vector<3x5x256xf32> to vector<1x4x256xf32>
    %45 = vector.shape_cast %44 : vector<1x4x256xf32> to vector<4x256xf32>
    %46 = vector.extract_strided_slice %0 {offsets = [1, 0, 0], sizes = [1, 4, 256], strides = [1, 1, 1]} : vector<3x5x256xf32> to vector<1x4x256xf32>
    %47 = vector.shape_cast %46 : vector<1x4x256xf32> to vector<4x256xf32>
    %48 = arith.subf %45, %47 : vector<4x256xf32>
    %49 = vector.extract_strided_slice %0 {offsets = [2, 1, 0], sizes = [1, 4, 256], strides = [1, 1, 1]} : vector<3x5x256xf32> to vector<1x4x256xf32>
    %50 = vector.shape_cast %49 : vector<1x4x256xf32> to vector<4x256xf32>
    %51 = vector.extract_strided_slice %0 {offsets = [2, 0, 0], sizes = [1, 4, 256], strides = [1, 1, 1]} : vector<3x5x256xf32> to vector<1x4x256xf32>
    %52 = vector.shape_cast %51 : vector<1x4x256xf32> to vector<4x256xf32>
    %53 = arith.subf %50, %52 : vector<4x256xf32>
    %c0_18 = arith.constant 0 : index
    %c0_19 = arith.constant 0 : index
    %54 = memref.load %arg1[%c0_18, %c0_19] : memref<3x2xf32, #tpu.memory_space<smem>>
    %55 = vector.broadcast %54 : f32 to vector<4x256xf32>
    %56 = arith.mulf %55, %43 : vector<4x256xf32>
    %c1_20 = arith.constant 1 : index
    %c0_21 = arith.constant 0 : index
    %57 = memref.load %arg1[%c1_20, %c0_21] : memref<3x2xf32, #tpu.memory_space<smem>>
    %58 = vector.broadcast %57 : f32 to vector<4x256xf32>
    %59 = arith.mulf %58, %48 : vector<4x256xf32>
    %60 = arith.addf %56, %59 : vector<4x256xf32>
    %c2_22 = arith.constant 2 : index
    %c0_23 = arith.constant 0 : index
    %61 = memref.load %arg1[%c2_22, %c0_23] : memref<3x2xf32, #tpu.memory_space<smem>>
    %62 = vector.broadcast %61 : f32 to vector<4x256xf32>
    %63 = arith.mulf %62, %53 : vector<4x256xf32>
    %64 = arith.addf %60, %63 : vector<4x256xf32>
    %c0_24 = arith.constant 0 : index
    %c1_25 = arith.constant 1 : index
    %65 = memref.load %arg1[%c0_24, %c1_25] : memref<3x2xf32, #tpu.memory_space<smem>>
    %66 = vector.broadcast %65 : f32 to vector<4x256xf32>
    %67 = arith.mulf %66, %43 : vector<4x256xf32>
    %c1_26 = arith.constant 1 : index
    %c1_27 = arith.constant 1 : index
    %68 = memref.load %arg1[%c1_26, %c1_27] : memref<3x2xf32, #tpu.memory_space<smem>>
    %69 = vector.broadcast %68 : f32 to vector<4x256xf32>
    %70 = arith.mulf %69, %48 : vector<4x256xf32>
    %71 = arith.addf %67, %70 : vector<4x256xf32>
    %c2_28 = arith.constant 2 : index
    %c1_29 = arith.constant 1 : index
    %72 = memref.load %arg1[%c2_28, %c1_29] : memref<3x2xf32, #tpu.memory_space<smem>>
    %73 = vector.broadcast %72 : f32 to vector<4x256xf32>
    %74 = arith.mulf %73, %53 : vector<4x256xf32>
    %75 = arith.addf %71, %74 : vector<4x256xf32>
    %cst_30 = arith.constant -2.000000e+01 : f32
    %cst_31 = arith.constant 2.000000e+01 : f32
    %76 = vector.broadcast %cst_30 : f32 to vector<4x256xf32>
    %77 = arith.maximumf %76, %64 : vector<4x256xf32>
    %78 = vector.broadcast %cst_31 : f32 to vector<4x256xf32>
    %79 = arith.minimumf %78, %77 : vector<4x256xf32>
    %cst_32 = arith.constant 2.000000e+01 : f32
    %80 = vector.broadcast %cst_32 : f32 to vector<4x256xf32>
    %81 = arith.addf %79, %80 : vector<4x256xf32>
    %cst_33 = arith.constant 6.375000e+00 : f32
    %82 = vector.broadcast %cst_33 : f32 to vector<4x256xf32>
    %83 = arith.mulf %81, %82 : vector<4x256xf32>
    %84 = math.floor %83 : vector<4x256xf32>
    %cst_34 = arith.constant 0.00784313772 : f32
    %85 = vector.broadcast %cst_34 : f32 to vector<4x256xf32>
    %86 = arith.mulf %84, %85 : vector<4x256xf32>
    %cst_35 = arith.constant 1.000000e+00 : f32
    %87 = vector.broadcast %cst_35 : f32 to vector<4x256xf32>
    %88 = arith.subf %86, %87 : vector<4x256xf32>
    %89 = vector.shape_cast %88 : vector<4x256xf32> to vector<1x4x256xf32>
    %cst_36 = arith.constant dense<0.000000e+00> : vector<1xf32>
    %90 = vector.multi_reduction <add>, %89, %cst_36 [1, 2] : vector<1x4x256xf32> to vector<1xf32>
    %91 = vector.shape_cast %90 : vector<1xf32> to vector<1x1x1xf32>
    %92 = vector.extract %91[0, 0, 0] : f32 from vector<1x1x1xf32>
    %cst_37 = arith.constant 9.765625E-4 : f32
    %93 = arith.mulf %92, %cst_37 : f32
    %cst_38 = arith.constant -2.000000e+01 : f32
    %cst_39 = arith.constant 2.000000e+01 : f32
    %94 = vector.broadcast %cst_38 : f32 to vector<4x256xf32>
    %95 = arith.maximumf %94, %75 : vector<4x256xf32>
    %96 = vector.broadcast %cst_39 : f32 to vector<4x256xf32>
    %97 = arith.minimumf %96, %95 : vector<4x256xf32>
    %cst_40 = arith.constant 2.000000e+01 : f32
    %98 = vector.broadcast %cst_40 : f32 to vector<4x256xf32>
    %99 = arith.addf %97, %98 : vector<4x256xf32>
    %cst_41 = arith.constant 6.375000e+00 : f32
    %100 = vector.broadcast %cst_41 : f32 to vector<4x256xf32>
    %101 = arith.mulf %99, %100 : vector<4x256xf32>
    %102 = math.floor %101 : vector<4x256xf32>
    %cst_42 = arith.constant 0.00784313772 : f32
    %103 = vector.broadcast %cst_42 : f32 to vector<4x256xf32>
    %104 = arith.mulf %102, %103 : vector<4x256xf32>
    %cst_43 = arith.constant 1.000000e+00 : f32
    %105 = vector.broadcast %cst_43 : f32 to vector<4x256xf32>
    %106 = arith.subf %104, %105 : vector<4x256xf32>
    %107 = vector.shape_cast %106 : vector<4x256xf32> to vector<1x4x256xf32>
    %cst_44 = arith.constant dense<0.000000e+00> : vector<1xf32>
    %108 = vector.multi_reduction <add>, %107, %cst_44 [1, 2] : vector<1x4x256xf32> to vector<1xf32>
    %109 = vector.shape_cast %108 : vector<1xf32> to vector<1x1x1xf32>
    %110 = vector.extract %109[0, 0, 0] : f32 from vector<1x1x1xf32>
    %cst_45 = arith.constant 9.765625E-4 : f32
    %111 = arith.mulf %110, %cst_45 : f32
    %c0_46 = arith.constant 0 : index
    %c0_47 = arith.constant 0 : index
    %112 = vector.load %arg5[%c0_46, %c0_47] : memref<1x1024xf32, #tpu.memory_space<vmem>>, vector<1x1024xf32>
    %c0_48 = arith.constant 0 : index
    %c0_49 = arith.constant 0 : index
    %113 = vector.load %arg4[%c0_48, %c0_49] : memref<2x1024xf32, #tpu.memory_space<vmem>>, vector<1x1024xf32>
    %114 = vector.broadcast %93 : f32 to vector<1x1024xf32>
    %115 = arith.mulf %114, %113 : vector<1x1024xf32>
    %116 = arith.addf %112, %115 : vector<1x1024xf32>
    %c1_50 = arith.constant 1 : index
    %c0_51 = arith.constant 0 : index
    %117 = vector.load %arg4[%c1_50, %c0_51] : memref<2x1024xf32, #tpu.memory_space<vmem>>, vector<1x1024xf32>
    %118 = vector.broadcast %111 : f32 to vector<1x1024xf32>
    %119 = arith.mulf %118, %117 : vector<1x1024xf32>
    %120 = arith.addf %116, %119 : vector<1x1024xf32>
    %c0_52 = arith.constant 0 : index
    %c0_53 = arith.constant 0 : index
    %121 = vector.load %arg10[%c0_52, %c0_53] : memref<1x1024xf32, #tpu.memory_space<vmem>>, vector<1x1024xf32>
    tpu.vector_store %arg10[%c0_52, %c0_53], %120 {strides = array<i32>} : memref<1x1024xf32, #tpu.memory_space<vmem>>, vector<1x1024xf32>,
    %c0_54 = arith.constant 0 : index
    %c0_55 = arith.constant 0 : index
    %122 = vector.load %arg6[%c0_54, %c0_55] : memref<4x32xf32, #tpu.memory_space<vmem>>, vector<4x32xf32>
    %c0_56 = arith.constant 0 : index
    %c0_57 = arith.constant 0 : index
    %123 = vector.load %arg7[%c0_56, %c0_57] : memref<32x128xf32, #tpu.memory_space<vmem>>, vector<32x128xf32>
    %cst_58 = arith.constant dense<0.000000e+00> : vector<4x128xf32>
    %124 = tpu.matmul %122, %123, %cst_58 {dimension_numbers = #tpu.dot_dimension_numbers<[1], [0], [0], [1], [0, 0, 1, 1], [], []>} : vector<4x32xf32>, vector<32x128xf32>, vector<4x128xf32> -> vector<4x128xf32>
    %c0_59 = arith.constant 0 : index
    %c0_60 = arith.constant 0 : index
    %125 = vector.load %arg8[%c0_59, %c0_60] : memref<1x128xf32, #tpu.memory_space<vmem>>, vector<1x128xf32>
    %126 = vector.broadcast %125 : vector<1x128xf32> to vector<4x128xf32>
    %127 = arith.addf %124, %126 : vector<4x128xf32>
    %cst_61 = arith.constant 0.000000e+00 : f32
    %128 = vector.broadcast %cst_61 : f32 to vector<4x128xf32>
    %129 = arith.maximumf %127, %128 : vector<4x128xf32>
    %c0_62 = arith.constant 0 : index
    %c0_63 = arith.constant 0 : index
    %130 = vector.load %arg11[%c0_62, %c0_63] : memref<4x128xf32, #tpu.memory_space<vmem>>, vector<4x128xf32>
    tpu.vector_store %arg11[%c0_62, %c0_63], %129 {strides = array<i32>} : memref<4x128xf32, #tpu.memory_space<vmem>>, vector<4x128xf32>,
    return
  }
}

</mosaic_0001>

<bundles_post_ra>
// kernel: tpu_custom_call.1
= control target key start
LH: loop header
LB: loop body
LE: loop exit
PB: predicated region body
PF: predicated region fallthrough
CT: control target
= control target key end

     0   :  { %17 = vsyncpa [#allocation4], 0  ;;  %s713_s0 = inlined_call_operand.vmem [shape: f32[3,5,256], index: 0, kind: input, shape index: {}]   ;;  %s714_s1 = inlined_call_operand.vmem [shape: f32[3,2], index: 1, kind: input, shape index: {}]   ;;  %s715_s2 = inlined_call_operand.vmem [shape: f32[3,1024], index: 2, kind: input, shape index: {}]   ;;  %s716_s3 = inlined_call_operand.vmem [shape: f32[1,1024], index: 3, kind: input, shape index: {}]   ;;  %s717_s4 = inlined_call_operand.vmem [shape: f32[2,1024], index: 4, kind: input, shape index: {}]   ;;  %s718_s5 = inlined_call_operand.vmem [shape: f32[1,1024], index: 5, kind: input, shape index: {}]   ;;  %s719_s6 = inlined_call_operand.vmem [shape: f32[4,32], index: 6, kind: input, shape index: {}]   ;;  %s720_s7 = inlined_call_operand.vmem [shape: f32[32,128], index: 7, kind: input, shape index: {}]   ;;  %s721_s8 = inlined_call_operand.vmem [shape: f32[1,128], index: 8, kind: input, shape index: {}]   ;;  %s722_s9 = inlined_call_operand.hbm [shape: f32[1,1024], index: 9, kind: output, shape index: {0}]   ;;  %s723_s10 = inlined_call_operand.hbm [shape: f32[1,1024], index: 10, kind: output, shape index: {1}]   ;;  %s724_s11 = inlined_call_operand.hbm [shape: f32[4,128], index: 11, kind: output, shape index: {2}]  }
   0x1   :  { %18 = vsyncpa [#allocation3], 0 }
   0x2   :  { %19 = vsyncpa [#allocation7], 0  ;;  %s28_s19 = sshll.u32 %s714_s1, 4  ;;  %s29_s19 = int_to_ptr.vmem [resolvable:$true] %s28_s19 }
   0x3   :  { %s438_s20 = scalar_lea.vmem %s29_s19, 64  ;;  %p443_p1 = scmp.lt.s32.totalorder %s29_s19, %s29_s19 }
   0x4   :  { %p439_p0 = scmp.ne.s32.totalorder %s29_s19, %s438_s20  ;;  %p444_p2 = scmp.lt.s32.totalorder %s438_s20, %s438_s20 }
   0x6   :  { %p445_p3 = por %p444_p2, %p443_p1 }
   0x8   :  { %p446_p4 = pnand %p445_p3, %p439_p0 }
   0xa   :  { %449 = shalt.err (!%p446_p4)
}
   0xb   :  { %s522_s21 = smov [#allocation2]  }
   0xc   :  { %31 = dma.vmem_to_smem %s29_s19, 64, %s522_s21, [#allocation4]  }
   0xd   :  { %516 = dma.done.wait [#allocation4], 64  }
   0xe   :  { %517 = vsyncadd [#allocation4], 4294967232 }
   0xf   :  { %49 = sfence }
  0x10   :  { %v50_v0 = vld [vmem:[%s713_s0] sm:$0x1f]  ;;  %v51_v1 = vld [vmem:[%s713_s0 + $0x8] sm:$0x1f]  ;;  %vm57_vm0 = vcmask 1043456   ;;  %s600_s1 = sld [smem:[#allocation2]] }
  0x11   :  { %v58_v2 = vsel %vm57_vm0, %v50_v0, 0.0  ;;  %v59_v3 = vsel %vm57_vm0, %v51_v1, 0.0  ;;  %v117_v4 = vrot.slane %v50_v0, 7  ;;  %v118_v5 = vrot.slane %v51_v1, 7  ;;  %s602_s26 = sld [smem:[#allocation2 + $0x1]]  ;;  %s612_s12 = sld [smem:[#allocation2 + $0x80]] }
  0x12   :  { %v523_v6 = vmov 0.0|0.0   ;;  %v60_v7 = vadd.f32 %v59_v3, %v58_v2  ;;  %v52_v8 = vld [vmem:[%s713_s0 + $0x10] sm:$0x1f]  ;;  %v53_v9 = vld [vmem:[%s713_s0 + $0x18] sm:$0x1f]  ;;  %s614_s13 = sld [smem:[#allocation2 + $0x81]] }
  0x13   :  { %415 = vmatprep.subr.bf16.mxu0 %v523_v6  ;;  %v121_v10 = vsub.f32 %v50_v0, %v117_v4  ;;  %v76_v11 = vsel %vm57_vm0, %v52_v8, 0.0  ;;  %v77_v12 = vsel %vm57_vm0, %v53_v9, 0.0  ;;  %v122_v13 = vsub.f32 %v51_v1, %v118_v5  ;;  %v249_v17 = vld [vmem:[%s720_s7] sm:$0xff]  ;;  %v250_v18 = vld [vmem:[%s720_s7 + $0x8] sm:$0xff]  ;;  %s629_s22 = sld [smem:[#allocation2 + $0x100]]  ;;  %s632_s23 = sld [smem:[#allocation2 + $0x101]] }
  0x14   :  { %61 = vadd.xlane.f32.xlu0 %v60_v7  ;;  %v78_v14 = vadd.f32 %v77_v12, %v76_v11  ;;  %v125_v15 = vrot.slane %v52_v8, 7  ;;  %v126_v16 = vrot.slane %v53_v9, 7  ;;  %v54_v19 = vld [vmem:[%s713_s0 + $0x20] sm:$0x1f]  ;;  %v416_v20 = vpack.c.bf16 %v250_v18, %v249_v17  ;;  %v55_v21 = vld [vmem:[%s713_s0 + $0x28] sm:$0x1f] }
  0x15   :  { %v95_v22 = vsel %vm57_vm0, %v54_v19, 0.0  ;;  %v133_v23 = vrot.slane %v54_v19, 7  ;;  %v96_v26 = vsel %vm57_vm0, %v55_v21, 0.0  ;;  %v134_v27 = vrot.slane %v55_v21, 7  ;;  %v251_v28 = vld [vmem:[%s720_s7 + $0x10] sm:$0xff]  ;;  %v252_v29 = vld [vmem:[%s720_s7 + $0x18] sm:$0xff] }
  0x16   :  { %v129_v24 = vsub.f32 %v52_v8, %v125_v15  ;;  %v130_v25 = vsub.f32 %v53_v9, %v126_v16  ;;  %v140_v30 = vstv %s600_s1  ;;  %417 = vmatpush3.bf16.msra.mxu0 %v416_v20  ;;  %v97_v31 = vadd.f32 %v96_v26, %v95_v22  ;;  %v248_v47 = vld [vmem:[%s719_s6] sm:$0xf] }
  0x17   :  { %v137_v32 = vsub.f32 %v54_v19, %v133_v23  ;;  %v419_v33 = vpack.c.bf16 %v252_v29, %v251_v28  ;;  %v141_v34 = vmul.f32 %v140_v30, %v121_v10  ;;  %v142_v35 = vmul.f32 %v140_v30, %v122_v13  ;;  %418 = vmatprep.subr.bf16.mxu0 %v523_v6 }
  0x18   :  { %v156_v36 = vstv %s602_s26  ;;  %79 = vadd.xlane.f32.xlu0 %v78_v14  ;;  %v138_v37 = vsub.f32 %v55_v21, %v134_v27  ;;  %v144_v40 = vstv %s612_s12  ;;  %v160_v41 = vstv %s614_s13  ;;  %98 = vadd.xlane.f32.xlu1 %v97_v31 }
  0x19   :  { %v157_v38 = vmul.f32 %v156_v36, %v121_v10  ;;  %v158_v39 = vmul.f32 %v156_v36, %v122_v13  ;;  %v145_v42 = vmul.f32 %v144_v40, %v129_v24  ;;  %v146_v43 = vmul.f32 %v144_v40, %v130_v25 }
  0x1a   :  { %v161_v44 = vmul.f32 %v160_v41, %v129_v24  ;;  %v162_v45 = vmul.f32 %v160_v41, %v130_v25  ;;  %v150_v46 = vstv %s629_s22  ;;  %420 = vmatpush3.bf16.msra.mxu0 %v419_v33  ;;  %vm260_vm1 = vcmask 261120  }
  0x1b   :  { %v151_v48 = vmul.f32 %v150_v46, %v137_v32  ;;  %v152_v49 = vmul.f32 %v150_v46, %v138_v37  ;;  %v166_v50 = vstv %s632_s23  ;;  %vm524_vm2 = vmmov 0  }
  0x1c   :  { %v525_v51 = vmov 0.0   ;;  %v147_v52 = vadd.f32 %v145_v42, %v141_v34  ;;  %v167_v53 = vmul.f32 %v166_v50, %v137_v32  ;;  %v168_v54 = vmul.f32 %v166_v50, %v138_v37 }
  0x1d   :  { %412 = vmatprep.mubr.msk.f32.mxu0 %vm524_vm2, %v525_v51  ;;  %v148_v55 = vadd.f32 %v146_v43, %v142_v35  ;;  %v163_v56 = vadd.f32 %v161_v44, %v157_v38  ;;  %v164_v58 = vadd.f32 %v162_v45, %v158_v39 }
  0x1e   :  { %413 = vmatmul.mubr.msk.f32.vlgmr.msra.gmra.mrb[0].mxu0 %vm260_vm1, %v248_v47  ;;  %v153_v57 = vadd.f32 %v151_v48, %v147_v52 }
  0x1f   :  { %v154_v59 = vadd.f32 %v152_v49, %v148_v55  ;;  %v169_v60 = vadd.f32 %v167_v53, %v163_v56  ;;  %v170_v62 = vadd.f32 %v168_v54, %v164_v58 }
  0x20   :  { %v388_v61 = vclamps-f32 %v153_v57, 20.0 }
  0x21   :  { %v389_v63 = vclamps-f32 %v154_v59, 20.0  ;;  %v392_v0 = vclamps-f32 %v169_v60, 20.0  ;;  %v393_v2 = vclamps-f32 %v170_v62, 20.0 }
  0x22   :  { %v175_v1 = vadd.f32 20.0, %v388_v61 }
  0x23   :  { %v176_v3 = vadd.f32 20.0, %v389_v63  ;;  %v208_v4 = vadd.f32 20.0, %v392_v0  ;;  %v209_v6 = vadd.f32 20.0, %v393_v2 }
  0x24   :  { %v177_v5 = vmul.f32 6.375, %v175_v1 }
  0x25   :  { %v178_v7 = vmul.f32 6.375, %v176_v3  ;;  %v210_v8 = vmul.f32 6.375, %v208_v4  ;;  %v211_v10 = vmul.f32 6.375, %v209_v6  ;;  %v72_v3 = vld [vmem:[%s715_s2] ss:$4 sm:$0xff] }
  0x26   :  { %v179_v9 = vfloor.f32 %v177_v5  ;;  %v56_v4 = vld [vmem:[%s716_s3] sm:$0xff]  ;;  %s526_s3 = smov [#allocation5]  }
  0x27   :  { %v180_v11 = vfloor.f32 %v178_v7  ;;  %v212_v12 = vfloor.f32 %v210_v8  ;;  %v213_v14 = vfloor.f32 %v211_v10  ;;  %v380_v7 = vld [vmem:[%s715_s2 + $0x1] ss:$4 sm:$0xff]  ;;  %s342_s24 = sshll.u32 %s526_s3, 4  ;;  %s343_s24 = int_to_ptr.vmem [resolvable:$true] %s342_s24 }
  0x28   :  { %v181_v13 = vmul.f32 0.007843138, %v179_v9  ;;  %v382_v9 = vld [vmem:[%s715_s2 + $0x2] ss:$4 sm:$0xff]  ;;  %s450_s0 = scalar_lea.vmem %s343_s24, 128  ;;  %p455_p6 = scmp.lt.s32.totalorder %s343_s24, %s343_s24 }
  0x29   :  { %v182_v15 = vmul.f32 0.007843138, %v180_v11  ;;  %v214_v16 = vmul.f32 0.007843138, %v212_v12  ;;  %v215_v18 = vmul.f32 0.007843138, %v213_v14  ;;  %p451_p5 = scmp.ne.s32.totalorder %s343_s24, %s450_s0  ;;  %p456_p7 = scmp.lt.s32.totalorder %s450_s0, %s450_s0 }
  0x2a   :  { %v390_v17 = vadd.f32 -1.0, %v181_v13 }
  0x2b   :  { %v391_v19 = vadd.f32 -1.0, %v182_v15  ;;  %v394_v20 = vadd.f32 -1.0, %v214_v16  ;;  %v395_v22 = vadd.f32 -1.0, %v215_v18  ;;  %v397_v16 = vld [vmem:[%s721_s8] ss:$0 sm:$0xff]  ;;  %p457_p8 = por %p456_p7, %p455_p6 }
  0x2c   :  { %v187_v21 = vrot.slane %v390_v17, 1 }
  0x2d   :  { %v188_v23 = vrot.slane %v391_v19, 1  ;;  %v220_v24 = vrot.slane %v394_v20, 1  ;;  %v221_v26 = vrot.slane %v395_v22, 1  ;;  %p458_p9 = pnand %p457_p8, %p451_p5 }
  0x2e   :  { %v191_v25 = vsel %vm57_vm0, %v187_v21, 0.0 }
  0x2f   :  { %v192_v27 = vsel %vm57_vm0, %v188_v23, 0.0  ;;  %v224_v28 = vsel %vm57_vm0, %v220_v24, 0.0  ;;  %v225_v30 = vsel %vm57_vm0, %v221_v26, 0.0 }
  0x30   :  { %v193_v29 = vadd.f32 %v192_v27, %v191_v25  ;;  %v226_v31 = vadd.f32 %v225_v30, %v224_v28 }
  0x32   :  { %194 = vadd.xlane.f32.xlu1 %v193_v29  ;;  %227 = vadd.xlane.f32.xlu0 %v226_v31 }
  0xa1   :  { %v62_v32 = vpop.xlane.xlu0 %61 }
  0xa2   :  { %v63_v33 = vrot.slane %v62_v32, 4 }
  0xa4   :  { %v64_v34 = vadd.f32 %v63_v33, %v62_v32 }
  0xa5   :  { %v80_v35 = vpop.xlane.xlu0 %79  ;;  %v99_v38 = vpop.xlane.xlu1 %98 }
  0xa6   :  { %v65_v36 = vrot.slane %v64_v34, 2  ;;  %v81_v37 = vrot.slane %v80_v35, 4  ;;  %v100_v39 = vrot.slane %v99_v38, 4 }
  0xa8   :  { %v82_v40 = vadd.f32 %v81_v37, %v80_v35  ;;  %v66_v41 = vadd.f32 %v65_v36, %v64_v34  ;;  %v101_v42 = vadd.f32 %v100_v39, %v99_v38 }
  0xaa   :  { %v83_v43 = vrot.slane %v82_v40, 2  ;;  %v67_v44 = vrot.slane %v66_v41, 1  ;;  %v102_v45 = vrot.slane %v101_v42, 2 }
  0xac   :  { %v68_v46 = vadd.f32 %v67_v44, %v66_v41  ;;  %v84_v47 = vadd.f32 %v83_v43, %v82_v40  ;;  %v103_v48 = vadd.f32 %v102_v45, %v101_v42 }
  0xae   :  { %421 = vpush %v68_v46  ;;  %v85_v49 = vrot.slane %v84_v47, 1  ;;  %v104_v50 = vrot.slane %v103_v48, 1 }
  0xb0   :  { %v86_v51 = vadd.f32 %v85_v49, %v84_v47  ;;  %v105_v52 = vadd.f32 %v104_v50, %v103_v48 }
  0xb2   :  { %423 = vpush %v86_v51 }
  0xb3   :  { %425 = vpush %v105_v52 }
  0xbf   :  { %v195_v53 = vpop.xlane.xlu1 %194  ;;  %v228_v55 = vpop.xlane.xlu0 %227 }
  0xc0   :  { %v196_v54 = vrot.slane %v195_v53, 4  ;;  %v229_v56 = vrot.slane %v228_v55, 4 }
  0xc2   :  { %v197_v57 = vadd.f32 %v196_v54, %v195_v53  ;;  %v230_v58 = vadd.f32 %v229_v56, %v228_v55 }
  0xc4   :  { %v198_v59 = vrot.slane %v197_v57, 2  ;;  %v231_v60 = vrot.slane %v230_v58, 2 }
  0xc6   :  { %v199_v61 = vadd.f32 %v198_v59, %v197_v57  ;;  %v232_v62 = vadd.f32 %v231_v60, %v230_v58 }
  0xc8   :  { %v200_v63 = vrot.slane %v199_v61, 1  ;;  %v233_v0 = vrot.slane %v232_v62, 1 }
  0xca   :  { %v201_v1 = vadd.f32 %v200_v63, %v199_v61  ;;  %v234_v2 = vadd.f32 %v233_v0, %v232_v62 }
  0xcc   :  { %427 = vpush %v201_v1 }
  0xcd   :  { %429 = vpush %v234_v2 }
  0xdf   :  { %s422_s6 = spop %421 }
  0xe0   :  { %s70_s26 = smul.f32 7.659314e-06, %s422_s6 }
  0xe2   :  { %s378_s28 = sadd.f32 -1.0, %s70_s26 }
  0xe3   :  { %s424_s12 = spop %423 }
  0xe4   :  { %v73_v5 = vstv %s378_s28  ;;  %s88_s15 = smul.f32 7.659314e-06, %s424_s12  ;;  %s426_s16 = spop %425 }
  0xe5   :  { %v74_v6 = vmul.f32 %v73_v5, %v72_v3  ;;  %s107_s17 = smul.f32 7.659314e-06, %s426_s16 }
  0xe6   :  { %s379_s18 = sadd.f32 -1.0, %s88_s15 }
  0xe7   :  { %v75_v8 = vadd.f32 %v74_v6, %v56_v4  ;;  %s381_s21 = sadd.f32 -1.0, %s107_s17 }
  0xe8   :  { %v92_v10 = vstv %s379_s18 }
  0xe9   :  { %v93_v11 = vmul.f32 %v380_v7, %v92_v10  ;;  %v111_v12 = vstv %s381_s21 }
  0xea   :  { %v112_v13 = vmul.f32 %v382_v9, %v111_v12 }
  0xeb   :  { %v94_v14 = vadd.f32 %v93_v11, %v75_v8 }
  0xed   :  { %v113_v15 = vadd.f32 %v112_v13, %v94_v14 }
  0xef   :  { %114 = vst [vmem:[#allocation5] sm:$0xff] %v113_v15 }
  0xf0   :  { %461 = shalt.err (!%p458_p9)
}
  0xf1   :  { %s462_s1 = scalar_lea.hbm %s722_s9, 128 }
  0xf2   :  { %p463_p10 = scmp.ne.s32.totalorder %s722_s9, %s462_s1  ;;  %p466_p11 = scmp.lt.u32.totalorder %s462_s1, %s722_s9 }
  0xf4   :  { %p468_p12 = pnand %p466_p11, %p463_p10 }
  0xf6   :  { %471 = shalt.err (!%p468_p12)
}
  0xf7   :  { %345 = dma.vmem_to_hbm [thread:$0]  %s343_s24, 128, %s722_s9, [#allocation3]   ;;  %v330_v17 = vpop.f32.mrb[0].mxu0  ;;  %v238_v21 = vld [vmem:[%s717_s4] ss:$2 sm:$0xff] }
  0xf8   :  { %v331_v18 = vadd.f32 %v397_v16, %v330_v17  ;;  %v414_v19 = vpop.f32.mrb[1].mxu0  ;;  %v396_v23 = vld [vmem:[%s717_s4 + $0x1] ss:$2 sm:$0xff]  ;;  %s527_s21 = smov [#allocation6]   ;;  %s528_s23 = smov [#allocation8]  }
  0xf9   :  { %v237_v24 = vld [vmem:[%s718_s5] sm:$0xff]  ;;  %s352_s22 = sshll.u32 %s527_s21, 4  ;;  %s362_s3 = sshll.u32 %s528_s23, 4  ;;  %s353_s22 = int_to_ptr.vmem [resolvable:$true] %s352_s22  ;;  %s363_s3 = int_to_ptr.vmem [resolvable:$true] %s362_s3 }
  0xfa   :  { %v334_v20 = vmax.f32 %v331_v18, 0.0  ;;  %s472_s24 = scalar_lea.vmem %s353_s22, 128  ;;  %p477_p0 = scmp.lt.s32.totalorder %s353_s22, %s353_s22 }
  0xfb   :  { %p473_p13 = scmp.ne.s32.totalorder %s353_s22, %s472_s24  ;;  %p478_p1 = scmp.lt.s32.totalorder %s472_s24, %s472_s24 }
  0xfc   :  { %335 = vst [vmem:[#allocation8] sm:$0xf] %v334_v20 }
  0xfd   :  { %s428_s12 = spop %427  ;;  %p479_p2 = por %p478_p1, %p477_p0 }
  0xfe   :  { %s203_s13 = smul.f32 0.0009765625, %s428_s12  ;;  %s430_s16 = spop %429 }
  0xff   :  { %s236_s17 = smul.f32 0.0009765625, %s430_s16  ;;  %p480_p3 = pnand %p479_p2, %p473_p13 }
 0x100   :  { %v239_v22 = vstv %s203_s13 }
 0x101   :  { %v240_v25 = vmul.f32 %v239_v22, %v238_v21  ;;  %v244_v26 = vstv %s236_s17 }
 0x102   :  { %v245_v27 = vmul.f32 %v396_v23, %v244_v26 }
 0x103   :  { %v241_v28 = vadd.f32 %v240_v25, %v237_v24 }
 0x105   :  { %v246_v29 = vadd.f32 %v245_v27, %v241_v28 }
 0x107   :  { %247 = vst [vmem:[#allocation6] sm:$0xff] %v246_v29 }
 0x108   :  { %483 = shalt.err (!%p480_p3)
}
 0x109   :  { %s484_s25 = scalar_lea.hbm %s723_s10, 128 }
 0x10a   :  { %p485_p4 = scmp.ne.s32.totalorder %s723_s10, %s484_s25  ;;  %p488_p5 = scmp.lt.u32.totalorder %s484_s25, %s723_s10 }
 0x10c   :  { %p490_p6 = pnand %p488_p5, %p485_p4 }
 0x10e   :  { %493 = shalt.err (!%p490_p6)
}
 0x10f   :  { %355 = dma.vmem_to_hbm [thread:$0]  %s353_s22, 128, %s723_s10, [#allocation7]  }
 0x110   :  { %s494_s26 = scalar_lea.vmem %s363_s3, 64  ;;  %p499_p8 = scmp.lt.s32.totalorder %s363_s3, %s363_s3 }
 0x111   :  { %p495_p7 = scmp.ne.s32.totalorder %s363_s3, %s494_s26  ;;  %p500_p9 = scmp.lt.s32.totalorder %s494_s26, %s494_s26 }
 0x113   :  { %p501_p10 = por %p500_p9, %p499_p8 }
 0x115   :  { %p502_p11 = pnand %p501_p10, %p495_p7 }
 0x117   :  { %505 = shalt.err (!%p502_p11)
}
 0x118   :  { %s506_s8 = scalar_lea.hbm %s724_s11, 64 }
 0x119   :  { %p507_p12 = scmp.ne.s32.totalorder %s724_s11, %s506_s8  ;;  %p510_p13 = scmp.lt.u32.totalorder %s506_s8, %s724_s11 }
 0x11b   :  { %p512_p0 = pnand %p510_p13, %p507_p12 }
 0x11d   :  { %515 = shalt.err (!%p512_p0)
}
 0x11e   :  { %365 = dma.vmem_to_hbm [thread:$0]  %s363_s3, 64, %s724_s11, [#allocation7]  }
 0x11f   :  { %518 = dma.done.wait [#allocation3], 128  }
 0x120   :  { %519 = vsyncadd [#allocation3], 4294967168 }
 0x121   :  { %520 = dma.done.wait [#allocation7], 192  }
 0x122   :  { %521 = vsyncadd [#allocation7], 4294967104 }
 0x123   :  { %375 = vsyncpa [#allocation3], 1 }
 0x124   :  { %376 = vsyncpa [#allocation7], 1 }
 0x125   :  { %377 = vsyncpa [#allocation4], 1 }

</bundles_post_ra>
